<compile_context>
chip_gen: v7x
topology: tpu7x:2x2x1
jax: 0.10.0
libtpu: 0.0.40
codegen_flags: <defaults>
</compile_context>

<pallas_src>
import jax
import jax.numpy as jnp
from jax.experimental import pallas as pl
from jax.experimental.pallas import tpu as pltpu

_LANE = 128
_SUBLANE = 8
_TARGET_BLOCK_BYTES = 2 * 1024 * 1024   # ~2 MiB blocks: >85% of HBM roofline;
                                        # ~8 MiB VMEM double-buffered -> safe on v7x.
_SINGLE_BLOCK_BYTES = 2 * 1024 * 1024   # below this, launch one whole-array block.


def _neg_scale_kernel(g_ref, lam_ref, o_ref):
    """o = (-lambda) * g.  lambda lives in SMEM; the scale is a single VPU multiply."""
    neg_lam = (-lam_ref[0]).astype(o_ref.dtype)
    o_ref[...] = g_ref[...] * neg_lam


def _lane_dense_2d(flat):
    """Reshape a flat array into a lane-dense 2-D slab without copying.

    Prefers a wide (multiple-of-128) last dimension so stores are full unmasked
    `vst`s.  No padding / extra HBM pass is needed whenever the element count is
    a multiple of 128 (always true for typical NCHW conv features); otherwise we
    pad up to one (8, 128) tile as a rare fallback.
    """
    n = flat.shape[0]
    for width in (4096, 2048, 1024, 512, 256, 128):
        if n % width == 0:
            return flat.reshape(n // width, width)
    # Rare fallback: pad to a whole (8, 128) tile (tiny arrays only, in practice).
    tile = _SUBLANE * _LANE
    n_pad = ((n + tile - 1) // tile) * tile
    flat = jnp.pad(flat, (0, n_pad - n))
    return flat.reshape(n_pad // _LANE, _LANE)


def _neg_scale(g, lam):
    """dx = -lam * g via a Pallas TPU kernel (pure bandwidth-bound elementwise)."""
    n = g.size
    if n == 0:
        return g
    lam_arr = jnp.asarray(lam, dtype=jnp.float32).reshape((1,))
    g2d = _lane_dense_2d(g.reshape(-1))
    rows, width = g2d.shape
    itemsize = g2d.dtype.itemsize
    total_bytes = rows * width * itemsize

    smem_spec = pl.BlockSpec(memory_space=pltpu.MemorySpace.SMEM)

    if total_bytes <= _SINGLE_BLOCK_BYTES:
        # Small tensor: one whole-array block, no grid-iteration overhead.
        out2d = pl.pallas_call(
            _neg_scale_kernel,
            out_shape=jax.ShapeDtypeStruct(g2d.shape, g2d.dtype),
            in_specs=[pl.BlockSpec(memory_space=pltpu.MemorySpace.VMEM),
                      smem_spec],
            out_specs=pl.BlockSpec(memory_space=pltpu.MemorySpace.VMEM),
            input_output_aliases={0: 0},
        )(g2d, lam_arr)
    else:
        # Large tensor: tile rows into ~2 MiB lane-dense blocks.  The grid axis
        # is "parallel" so v7x's two TensorCores split the work; a partial last
        # block (rows not divisible by block_rows) is masked by Pallas.
        block_rows = _TARGET_BLOCK_BYTES // (width * itemsize)
        block_rows = max(_SUBLANE, (block_rows // _SUBLANE) * _SUBLANE)
        block_rows = min(block_rows, rows)
        grid = ((rows + block_rows - 1) // block_rows,)
        out2d = pl.pallas_call(
            _neg_scale_kernel,
            out_shape=jax.ShapeDtypeStruct(g2d.shape, g2d.dtype),
            grid=grid,
            in_specs=[pl.BlockSpec((block_rows, width), lambda i: (i, 0)),
                      smem_spec],
            out_specs=pl.BlockSpec((block_rows, width), lambda i: (i, 0)),
            input_output_aliases={0: 0},
            compiler_params=pltpu.CompilerParams(
                dimension_semantics=("parallel",)),
        )(g2d, lam_arr)

    out_flat = out2d.reshape(-1)
    if out_flat.shape[0] != n:          # only hit in the rare padded fallback
        out_flat = out_flat[:n]
    return out_flat.reshape(g.shape)


@jax.custom_vjp
def _grl(x, lam):
    # Forward of the Gradient Reversal Layer: identity.  JAX arrays are
    # immutable, so PyTorch's `x.clone()` semantics hold with no copy and no
    # kernel launch (forward HBM round trip eliminated per perf feedback).
    return x


def _grl_fwd(x, lam):
    return x, lam


def _grl_bwd(lam, g):
    # Upstream gradient is reversed and scaled: dx = -lambda * g (Pallas kernel).
    # lambda gets a zero cotangent (PyTorch returns None for it).
    return _neg_scale(g, lam), jnp.zeros_like(lam)


_grl.defvjp(_grl_fwd, _grl_bwd)


def gradient_reversal(x, lambda_=1.0):
    """Identity in the forward pass; multiplies gradients by -lambda_ in backward."""
    lam = jnp.asarray(lambda_, dtype=jnp.float32)
    return _grl(x, lam)


class GradientReversal:
    """Thin wrapper mirroring the PyTorch nn.Module interface."""

    def __init__(self, lambda_=1.0):
        self.lambda_ = float(lambda_)

    def set_lambda(self, lambda_new):
        self.lambda_ = float(lambda_new)

    def __call__(self, x):
        return gradient_reversal(x, self.lambda_)


if __name__ == "__main__":
    key = jax.random.PRNGKey(0)

    # Small NCHW input consistent with typical conv-feature usage of this module.
    x = jax.random.normal(key, (2, 4, 16, 16), dtype=jnp.float32)

    grl = GradientReversal(lambda_=1.0)

    # Forward: identity (no kernel; clone semantics are free with immutable arrays).
    y = jax.block_until_ready(grl(x))
    assert y.shape == x.shape and y.dtype == x.dtype
    assert jnp.allclose(y, x), "forward is not identity"

    # Backward (small tensor -> single-block kernel path): d/dx sum(GRL(x)) == -lambda.
    g = jax.grad(lambda z: jnp.sum(gradient_reversal(z, 0.5)))(x)
    g = jax.block_until_ready(g)
    assert jnp.allclose(g, -0.5 * jnp.ones_like(x)), "backward is not -lambda * grad"

    # Backward with a non-trivial cotangent and a different lambda (runtime SMEM
    # scalar -> no kernel recompile when lambda changes).
    ct = jax.random.normal(jax.random.PRNGKey(1), x.shape, dtype=jnp.float32)
    _, vjp_fn = jax.vjp(lambda z: gradient_reversal(z, 2.0), x)
    (dx,) = vjp_fn(ct)
    dx = jax.block_until_ready(dx)
    assert jnp.allclose(dx, -2.0 * ct), "vjp mismatch"

    # Exercise the tiled (gridded) kernel path with a larger gradient tensor.
    big = jax.random.normal(jax.random.PRNGKey(2), (8, 32, 64, 64), dtype=jnp.float32)
    dbig = jax.block_until_ready(_neg_scale(big, jnp.float32(3.0)))
    assert jnp.allclose(dbig, -3.0 * big), "tiled kernel path mismatch"

    print("KERNEL_OK")
</pallas_src>

<mosaic_0001>
module attributes {stable_mosaic.version = 11 : i64} {
  func.func @_neg_scale_kernel(%arg0: memref<1x2048xf32, #tpu.memory_space<vmem>>, %arg1: memref<1xf32, #tpu.memory_space<smem>>, %arg2: memref<1x2048xf32, #tpu.memory_space<vmem>>) attributes {dimension_semantics = [], scalar_prefetch = 0 : i64, scratch_operands = 0 : i64, tpu.core_type = #tpu.core_type<tc>} {
    %c0 = arith.constant 0 : index
    %0 = memref.load %arg1[%c0] : memref<1xf32, #tpu.memory_space<smem>>
    %cst = arith.constant 0.000000e+00 : f32
    %1 = arith.subf %cst, %0 : f32
    %c0_0 = arith.constant 0 : index
    %c0_1 = arith.constant 0 : index
    %2 = vector.load %arg0[%c0_0, %c0_1] : memref<1x2048xf32, #tpu.memory_space<vmem>>, vector<1x2048xf32>
    %3 = vector.broadcast %1 : f32 to vector<1x2048xf32>
    %4 = arith.mulf %2, %3 : vector<1x2048xf32>
    %c0_2 = arith.constant 0 : index
    %c0_3 = arith.constant 0 : index
    %5 = vector.load %arg2[%c0_2, %c0_3] : memref<1x2048xf32, #tpu.memory_space<vmem>>, vector<1x2048xf32>
    tpu.vector_store %arg2[%c0_2, %c0_3], %4 {strides = array<i32>} : memref<1x2048xf32, #tpu.memory_space<vmem>>, vector<1x2048xf32>,
    return
  }
}

</mosaic_0001>

<bundles_post_ra>
// kernel: tpu_custom_call.1
= control target key start
LH: loop header
LB: loop body
LE: loop exit
PB: predicated region body
PF: predicated region fallthrough
CT: control target
= control target key end

     0   :  { %8 = vsyncpa [#allocation4], 0  ;;  %s143_s0 = inlined_call_operand.hbm [shape: f32[1,2048], index: 0, kind: input, shape index: {}, may-alias: {0,2}]   ;;  %s144_s1 = inlined_call_operand.<no memory space> [shape: f32[1], index: 1, kind: input, shape index: {}]   ;;  %s145_s2 = inlined_call_operand.hbm [shape: f32[1,2048], index: 2, kind: output, shape index: {}, may-alias: {0,2}]  }
   0x1   :  { %9 = vsyncpa [#allocation5], 0  ;;  %s99_s9 = smov [#allocation3]   ;;  %s51_s13 = scalar_lea.hbm %s143_s0, 256 }
   0x2   :  { %s16_s10 = sshll.u32 %s99_s9, 4  ;;  %p52_p0 = scmp.ne.s32.totalorder %s143_s0, %s51_s13  ;;  %s17_s10 = int_to_ptr.vmem [resolvable:$true] %s16_s10 }
   0x3   :  { %p55_p1 = scmp.lt.u32.totalorder %s51_s13, %s143_s0 }
   0x5   :  { %p57_p2 = pnand %p55_p1, %p52_p0 }
   0x7   :  { %60 = shalt.err (!%p57_p2)
}
   0x8   :  { %s61_s18 = scalar_lea.vmem %s17_s10, 256  ;;  %p66_p4 = scmp.lt.s32.totalorder %s17_s10, %s17_s10 }
   0x9   :  { %p62_p3 = scmp.ne.s32.totalorder %s17_s10, %s61_s18  ;;  %p67_p5 = scmp.lt.s32.totalorder %s61_s18, %s61_s18 }
   0xb   :  { %p68_p6 = por %p67_p5, %p66_p4 }
   0xd   :  { %p69_p7 = pnand %p68_p6, %p62_p3 }
   0xf   :  { %72 = shalt.err (!%p69_p7)
}
  0x10   :  { %19 = dma.hbm_to_vmem [thread:$0]  %s143_s0, 256, %s17_s10, [#allocation4]  }
  0x11   :  { %95 = dma.done.wait [#allocation4], 256  }
  0x12   :  { %96 = vsyncadd [#allocation4], 4294967040  ;;  %s26_s23 = ssub.f32 0.0, %s144_s1  ;;  %s100_s24 = smov [#allocation6]   ;;  %v27_v1 = vld [vmem:[#allocation3] sm:$0xff]  ;;  %v28_v2 = vld [vmem:[#allocation3 + $0x8] sm:$0xff] }
  0x13   :  { %s40_s25 = sshll.u32 %s100_s24, 4  ;;  %s41_s25 = int_to_ptr.vmem [resolvable:$true] %s40_s25 }
  0x14   :  { %v29_v0 = vstv %s26_s23  ;;  %s73_s26 = scalar_lea.vmem %s41_s25, 256  ;;  %p78_p9 = scmp.lt.s32.totalorder %s41_s25, %s41_s25 }
  0x15   :  { %v30_v3 = vmul.f32 %v29_v0, %v27_v1  ;;  %v31_v4 = vmul.f32 %v29_v0, %v28_v2  ;;  %p74_p8 = scmp.ne.s32.totalorder %s41_s25, %s73_s26  ;;  %p79_p10 = scmp.lt.s32.totalorder %s73_s26, %s73_s26 }
  0x17   :  { %32 = vst [vmem:[#allocation6] sm:$0xff] %v30_v3  ;;  %33 = vst [vmem:[#allocation6 + $0x8] sm:$0xff] %v31_v4  ;;  %p80_p11 = por %p79_p10, %p78_p9 }
  0x19   :  { %p81_p12 = pnand %p80_p11, %p74_p8 }
  0x1b   :  { %84 = shalt.err (!%p81_p12)
}
  0x1c   :  { %s85_s1 = scalar_lea.hbm %s145_s2, 256 }
  0x1d   :  { %p86_p13 = scmp.ne.s32.totalorder %s145_s2, %s85_s1  ;;  %p89_p0 = scmp.lt.u32.totalorder %s85_s1, %s145_s2 }
  0x1f   :  { %p91_p1 = pnand %p89_p0, %p86_p13 }
  0x21   :  { %94 = shalt.err (!%p91_p1)
}
  0x22   :  { %43 = dma.vmem_to_hbm [thread:$0]  %s41_s25, 256, %s145_s2, [#allocation5]  }
  0x23   :  { %97 = dma.done.wait [#allocation5], 256  }
  0x24   :  { %98 = vsyncadd [#allocation5], 4294967040 }
  0x25   :  { %47 = vsyncpa [#allocation4], 1 }
  0x26   :  { %48 = vsyncpa [#allocation5], 1 }

</bundles_post_ra>
